<compile_context>
chip_gen: v5e
topology: v5e:2x2
jax: 0.10.0
libtpu: 0.0.40
codegen_flags: <defaults>
</compile_context>

<pallas_src>
import functools
import math

import jax
import jax.numpy as jnp
from jax.experimental import pallas as pl
from jax.experimental.pallas import tpu as pltpu


# ---------------------------------------------------------------------------
# Kernel
# ---------------------------------------------------------------------------
def _attention_kernel(q_ref, v_ref, w_ref, o_ref, *, inv_sqrt_ddec, inv_seq_len):
    q = q_ref[...]              # (B, decoder_dim)
    v = v_ref[...]              # (B, T, encoder_dim)
    w = w_ref[...]              # (decoder_dim, encoder_dim)

    # ---- scores: scaled multiplicative attention ----
    # Single MXU matmul at default precision, then an elementwise multiply +
    # lane-axis reduction (VPU/XLU) for the per-timestep dot products.
    q_proj = jnp.dot(q, w, preferred_element_type=jnp.float32)           # (B, E)
    scores = jnp.sum(q_proj[:, None, :] * v, axis=-1) * inv_sqrt_ddec    # (B, T)

    # ---- softmax over the sequence axis (torch dim=1) ----
    m = jnp.max(scores, axis=-1, keepdims=True)
    e = jnp.exp(scores - m)
    weights = e / jnp.sum(e, axis=-1, keepdims=True)                     # (B, T)

    # ---- context = mean over T of (weights * values) ----
    ctx = jnp.sum(weights[:, :, None] * v, axis=1) * inv_seq_len         # (B, E)
    o_ref[...] = ctx.astype(o_ref.dtype)


# ---------------------------------------------------------------------------
# Wrapper
# ---------------------------------------------------------------------------
def attention_pallas(query, values, w):
    B, decoder_dim = query.shape
    Bv, seq_len, encoder_dim = values.shape
    assert B == Bv and w.shape == (decoder_dim, encoder_dim)

    kernel = functools.partial(
        _attention_kernel,
        inv_sqrt_ddec=1.0 / math.sqrt(decoder_dim),
        inv_seq_len=1.0 / seq_len,
    )
    vmem = pl.BlockSpec(memory_space=pltpu.MemorySpace.VMEM)
    return pl.pallas_call(
        kernel,
        out_shape=jax.ShapeDtypeStruct((B, encoder_dim), jnp.float32),
        in_specs=[vmem, vmem, vmem],
        out_specs=vmem,
    )(query, values, w)


# ---------------------------------------------------------------------------
# Pure-JAX reference (same math, no Pallas) for a sanity check
# ---------------------------------------------------------------------------
def attention_ref(query, values, w):
    decoder_dim = query.shape[1]
    seq_len = values.shape[1]
    q_proj = query @ w                                                   # (B, E)
    scores = jnp.einsum("be,bte->bt", q_proj, values) / math.sqrt(decoder_dim)
    weights = jax.nn.softmax(scores, axis=1)
    return jnp.sum(weights[:, :, None] * values, axis=1) / seq_len


if __name__ == "__main__":
    BATCH = 4
    SEQ = 8
    ENCODER_DIM = 128   # lane-dense output width
    DECODER_DIM = 64

    root = jax.random.PRNGKey(0)
    kq, kv, kw = jax.random.split(root, 3)
    query = jax.random.normal(kq, (BATCH, DECODER_DIM), jnp.float32)
    values = jax.random.normal(kv, (BATCH, SEQ, ENCODER_DIM), jnp.float32)
    w = jax.random.normal(kw, (DECODER_DIM, ENCODER_DIM), jnp.float32) / math.sqrt(DECODER_DIM)

    context = jax.block_until_ready(attention_pallas(query, values, w))
    ref = attention_ref(query, values, w)

    assert context.shape == (BATCH, ENCODER_DIM)
    assert jnp.allclose(context, ref, rtol=2e-2, atol=2e-2), "mismatch vs reference"
    print("KERNEL_OK")
</pallas_src>

<mosaic_0001>
module attributes {stable_mosaic.version = 11 : i64} {
  func.func @_attention_kernel(%arg0: memref<4x64xf32, #tpu.memory_space<vmem>>, %arg1: memref<4x8x128xf32, #tpu.memory_space<vmem>>, %arg2: memref<64x128xf32, #tpu.memory_space<vmem>>, %arg3: memref<4x128xf32, #tpu.memory_space<vmem>>) attributes {dimension_semantics = [], scalar_prefetch = 0 : i64, scratch_operands = 0 : i64, tpu.core_type = #tpu.core_type<tc>} {
    %c0 = arith.constant 0 : index
    %c0_0 = arith.constant 0 : index
    %0 = vector.load %arg0[%c0, %c0_0] : memref<4x64xf32, #tpu.memory_space<vmem>>, vector<4x64xf32>
    %c0_1 = arith.constant 0 : index
    %c0_2 = arith.constant 0 : index
    %c0_3 = arith.constant 0 : index
    %1 = vector.load %arg1[%c0_1, %c0_2, %c0_3] : memref<4x8x128xf32, #tpu.memory_space<vmem>>, vector<4x8x128xf32>
    %c0_4 = arith.constant 0 : index
    %c0_5 = arith.constant 0 : index
    %2 = vector.load %arg2[%c0_4, %c0_5] : memref<64x128xf32, #tpu.memory_space<vmem>>, vector<64x128xf32>
    %cst = arith.constant dense<0.000000e+00> : vector<4x128xf32>
    %3 = tpu.matmul %0, %2, %cst {dimension_numbers = #tpu.dot_dimension_numbers<[1], [0], [0], [1], [0, 0, 1, 1], [], []>} : vector<4x64xf32>, vector<64x128xf32>, vector<4x128xf32> -> vector<4x128xf32>
    %4 = vector.shape_cast %3 : vector<4x128xf32> to vector<4x1x128xf32>
    %5 = vector.broadcast %4 : vector<4x1x128xf32> to vector<4x8x128xf32>
    %6 = arith.mulf %5, %1 : vector<4x8x128xf32>
    %cst_6 = arith.constant dense<0.000000e+00> : vector<4x8xf32>
    %7 = vector.multi_reduction <add>, %6, %cst_6 [2] : vector<4x8x128xf32> to vector<4x8xf32>
    %cst_7 = arith.constant 1.250000e-01 : f32
    %8 = vector.broadcast %cst_7 : f32 to vector<4x8xf32>
    %9 = arith.mulf %7, %8 : vector<4x8xf32>
    %cst_8 = arith.constant dense<0xFF800000> : vector<4xf32>
    %10 = vector.multi_reduction <maximumf>, %9, %cst_8 [1] : vector<4x8xf32> to vector<4xf32>
    %11 = vector.shape_cast %10 : vector<4xf32> to vector<4x1xf32>
    %12 = vector.broadcast %11 : vector<4x1xf32> to vector<4x8xf32>
    %13 = arith.subf %9, %12 : vector<4x8xf32>
    %14 = math.exp %13 : vector<4x8xf32>
    %cst_9 = arith.constant dense<0.000000e+00> : vector<4xf32>
    %15 = vector.multi_reduction <add>, %14, %cst_9 [1] : vector<4x8xf32> to vector<4xf32>
    %16 = vector.shape_cast %15 : vector<4xf32> to vector<4x1xf32>
    %17 = vector.broadcast %16 : vector<4x1xf32> to vector<4x8xf32>
    %18 = arith.divf %14, %17 : vector<4x8xf32>
    %19 = vector.shape_cast %18 : vector<4x8xf32> to vector<4x8x1xf32>
    %20 = vector.broadcast %19 : vector<4x8x1xf32> to vector<4x8x128xf32>
    %21 = arith.mulf %20, %1 : vector<4x8x128xf32>
    %cst_10 = arith.constant dense<0.000000e+00> : vector<4x128xf32>
    %22 = vector.multi_reduction <add>, %21, %cst_10 [1] : vector<4x8x128xf32> to vector<4x128xf32>
    %cst_11 = arith.constant 1.250000e-01 : f32
    %23 = vector.broadcast %cst_11 : f32 to vector<4x128xf32>
    %24 = arith.mulf %22, %23 : vector<4x128xf32>
    %c0_12 = arith.constant 0 : index
    %c0_13 = arith.constant 0 : index
    %25 = vector.load %arg3[%c0_12, %c0_13] : memref<4x128xf32, #tpu.memory_space<vmem>>, vector<4x128xf32>
    tpu.vector_store %arg3[%c0_12, %c0_13], %24 {strides = array<i32>} : memref<4x128xf32, #tpu.memory_space<vmem>>, vector<4x128xf32>,
    return
  }
}

</mosaic_0001>

<bundles_post_ra>
// kernel: tpu_custom_call.1
= control target key start
LH: loop header
LB: loop body
LE: loop exit
PB: predicated region body
PF: predicated region fallthrough
CT: control target
= control target key end

     0   :  { %8 = vsyncpa [#allocation3], 0  ;;  %s561_s0 = inlined_call_operand.hbm [shape: f32[4,64], index: 0, kind: input, shape index: {}]   ;;  %s562_s1 = inlined_call_operand.hbm [shape: f32[4,8,128], index: 1, kind: input, shape index: {}]   ;;  %s563_s2 = inlined_call_operand.hbm [shape: f32[64,128], index: 2, kind: input, shape index: {}]   ;;  %s564_s3 = inlined_call_operand.hbm [shape: f32[4,128], index: 3, kind: output, shape index: {}]  }
   0x1   :  { %9 = vsyncpa [#allocation6], 0  ;;  %s26_s14 = sshll.u32 %s562_s1, 4  ;;  %s27_s14 = int_to_ptr.hbm [resolvable:$true] %s26_s14 }
   0x2   :  { %10 = vsyncpa [#allocation4], 0  ;;  %s471_s15 = smov [#allocation5]   ;;  %s16_s19 = sshll.u32 %s561_s0, 4  ;;  %s17_s19 = int_to_ptr.hbm [resolvable:$true] %s16_s19 }
   0x3   :  { %s28_s16 = sshll.u32 %s471_s15, 4  ;;  %s472_s20 = smov 128   ;;  %s29_s16 = int_to_ptr.vmem [resolvable:$true] %s28_s16 }
   0x4   :  { %s473_s21 = smov 8   ;;  %s474_s22 = smov [#allocation2]  }
   0x5   :  { %34 = dma.hbm_to_vmem [thread:$0]  %s27_s14, 512, %s29_s16, [#allocation6], %s472_s20, %s472_s20, %s473_s21  }
   0x6   :  { %s18_s23 = sshll.u32 %s474_s22, 4  ;;  %s39_s26 = sshll.u32 %s563_s2, 4  ;;  %s19_s23 = int_to_ptr.vmem [resolvable:$true] %s18_s23  ;;  %s40_s26 = int_to_ptr.hbm [resolvable:$true] %s39_s26 }
   0x7   :  { %21 = dma.hbm_to_vmem [thread:$0]  %s17_s19, 64, %s19_s23, [#allocation3]  }
   0x8   :  { %s475_s1 = smov [#allocation7]  }
   0x9   :  { %s41_s27 = sshll.u32 %s475_s1, 4  ;;  %s42_s27 = int_to_ptr.vmem [resolvable:$true] %s41_s27 }
   0xa   :  { %47 = dma.hbm_to_vmem [thread:$0]  %s40_s26, 1024, %s42_s27, [#allocation6], %s472_s20, %s472_s20, %s473_s21  }
   0xb   :  { %465 = dma.done.wait [#allocation3], 64  }
   0xc   :  { %466 = vsyncadd [#allocation3], 4294967232 }
   0xd   :  { %467 = dma.done.wait [#allocation6], 1536  }
   0xe   :  { %468 = vsyncadd [#allocation6], 4294965760  ;;  %v72_v0 = vld [vmem:[#allocation7 + $0x38] sm:$0xff]  ;;  %v71_v1 = vld [vmem:[#allocation7 + $0x30] sm:$0xff]  ;;  %vm73_vm0 = vcmask 523264   ;;  %v129_v27 = vlaneseq  ;;  %vm135_vm1 = vcmask 1041409  }
   0xf   :  { %85 = vmatpush.msra.mxu0 %v72_v0  ;;  %v70_v2 = vld [vmem:[#allocation7 + $0x28] sm:$0xff]  ;;  %v69_v3 = vld [vmem:[#allocation7 + $0x20] sm:$0xff]  ;;  %v68_v4 = vld [vmem:[#allocation7 + $0x18] sm:$0xff]  ;;  %vm137_vm2 = vcmask 1042434   ;;  %vm139_vm3 = vcmask 1043459   ;;  %vm142_vm4 = vcmask 60416  }
  0x10   :  { %v67_v5 = vld [vmem:[#allocation7 + $0x10] sm:$0xff]  ;;  %v66_v6 = vld [vmem:[#allocation7 + $0x8] sm:$0xff]  ;;  %v65_v7 = vld [vmem:[#allocation7] sm:$0xff]  ;;  %v130_v28 = vand.u32 127, %v129_v27  ;;  %v476_v43 = vmov 0   ;;  %s477_s0 = smov [#allocation8]  }
  0x11   :  { %86 = vmatpush.msra.mxu0 %v71_v1  ;;  %v60_v8 = vld [vmem:[#allocation2] sm:$0xf]  ;;  %v507_v10 = vld [vmem:[#allocation5] sm:$0xff]  ;;  %v509_v13 = vld [vmem:[#allocation5 + $0x10] sm:$0xff]  ;;  %352 = vset.pattern.permute.xlu1 %v476_v43  ;;  %s329_s2 = sshll.u32 %s477_s0, 4  ;;  %s331_s30 = sshll.u32 %s564_s3, 4  ;;  %s330_s2 = int_to_ptr.vmem [resolvable:$true] %s329_s2  ;;  %s332_s30 = int_to_ptr.hbm [resolvable:$true] %s331_s30 }
  0x12   :  { %v513_v20 = vld [vmem:[#allocation5 + $0x8] sm:$0xff]  ;;  %v515_v22 = vld [vmem:[#allocation5 + $0x18] sm:$0xff]  ;;  %351 = vset.pattern.permute.xlu0 %v476_v43  ;;  %350 = vset.pattern.permute.xlu2 %v476_v43 }
  0x13   :  { %87 = vmatpush.msra.mxu0 %v70_v2 }
  0x15   :  { %88 = vmatpush.msra.mxu0 %v69_v3 }
  0x17   :  { %89 = vmatpush.msra.mxu0 %v68_v4 }
  0x19   :  { %90 = vmatpush.msra.mxu0 %v67_v5 }
  0x1b   :  { %91 = vmatpush.msra.mxu0 %v66_v6 }
  0x1d   :  { %92 = vmatpush.msra.mxu0 %v65_v7 }
  0x1e   :  { %342 = vmatmul.msk.f32.vlgmr.msra.gmra.mxu0 %vm73_vm0, %v60_v8 }
  0x9b   :  { %v94_v9 = vpop.f32.mrf.mxu0 }
  0x9c   :  { %v101_v11 = vperm.slane %v94_v9, 0  ;;  %v99_v12 = vrot.slane %v94_v9, 2  ;;  %v98_v14 = vrot.slane %v94_v9, 1  ;;  %v100_v17 = vrot.slane %v94_v9, 3 }
  0x9e   :  { %v109_v15 = vmul.f32 %v101_v11, %v507_v10  ;;  %v103_v16 = vperm.slane %v99_v12, 0  ;;  %v102_v19 = vperm.slane %v98_v14, 0  ;;  %v104_v21 = vperm.slane %v100_v17, 0 }
  0xa0   :  { %113 = vadd.xlane.f32.xlu0 %v109_v15  ;;  %v111_v18 = vmul.f32 %v103_v16, %v509_v13  ;;  %v110_v23 = vmul.f32 %v102_v19, %v513_v20  ;;  %v112_v24 = vmul.f32 %v104_v21, %v515_v22 }
  0xa2   :  { %117 = vadd.xlane.f32.xlu1 %v111_v18 }
  0xa8   :  { %115 = vadd.xlane.f32.xlu0 %v110_v23 }
  0xaa   :  { %119 = vadd.xlane.f32.xlu1 %v112_v24 }
 0x113   :  { %v114_v25 = vpop.xlane.xlu0 %113 }
 0x114   :  { %v121_v29 = vmul.f32 0.125, %v114_v25 }
 0x115   :  { %v118_v26 = vpop.xlane.xlu1 %117 }
 0x116   :  { %v123_v30 = vmul.f32 0.125, %v118_v26  ;;  %v131_v34 = vperm.slane %v121_v29, %v130_v28 }
 0x118   :  { %v133_v37 = vperm.slane %v123_v30, %v130_v28 }
 0x11b   :  { %v116_v31 = vpop.xlane.xlu0 %115 }
 0x11c   :  { %v122_v32 = vmul.f32 0.125, %v116_v31 }
 0x11d   :  { %v120_v33 = vpop.xlane.xlu1 %119 }
 0x11e   :  { %v132_v35 = vperm.slane %v122_v32, %v130_v28  ;;  %v124_v36 = vmul.f32 0.125, %v120_v33 }
 0x120   :  { %v134_v38 = vperm.slane %v124_v36, %v130_v28  ;;  %v136_v39 = vsel %vm135_vm1, %v132_v35, %v131_v34 }
 0x121   :  { %v138_v40 = vsel %vm137_vm2, %v133_v37, %v136_v39 }
 0x122   :  { %v140_v41 = vsel %vm139_vm3, %v134_v38, %v138_v40 }
 0x123   :  { %v143_v42 = vsel %vm142_vm4, %v140_v41, -inf }
 0x124   :  { %144 = vmax.xlane.f32.xlu2 %v143_v42 }
 0x197   :  { %v145_v44 = vpop.xlane.xlu2 %144 }
 0x198   :  { %v147_v45 = vperm.slane %v145_v44, 0  ;;  %v148_v46 = vperm.slane %v145_v44, 1  ;;  %v149_v47 = vperm.slane %v145_v44, 2  ;;  %v150_v48 = vperm.slane %v145_v44, 3 }
 0x19a   :  { %v155_v49 = vsub.f32 %v121_v29, %v147_v45  ;;  %v156_v50 = vsub.f32 %v122_v32, %v148_v46  ;;  %v157_v51 = vsub.f32 %v123_v30, %v149_v47  ;;  %v158_v55 = vsub.f32 %v124_v36, %v150_v48 }
 0x19c   :  { %v159_v52 = vmul.f32 1.442695, %v155_v49  ;;  %v161_v53 = vmul.f32 1.442695, %v156_v50  ;;  %v163_v54 = vmul.f32 1.442695, %v157_v51 }
 0x19d   :  { %v165_v56 = vmul.f32 1.442695, %v158_v55 }
 0x19e   :  { %353 = vpow2.f32 %v159_v52 }
 0x19f   :  { %355 = vpow2.f32 %v161_v53 }
 0x1a0   :  { %357 = vpow2.f32 %v163_v54 }
 0x1a1   :  { %359 = vpow2.f32 %v165_v56 }
 0x1a4   :  { %v523_v57 = vpop.eup %353 }
 0x1a5   :  { %v525_v58 = vpop.eup %355  ;;  %172 = vperm.xlu2 %350, %v523_v57  }
 0x1a6   :  { %v528_v59 = vpop.eup %357  ;;  %175 = vperm.xlu0 %351, %v525_v58  }
 0x1a7   :  { %178 = vperm.xlu1 %352, %v528_v59   ;;  %v532_v60 = vpop.eup %359 }
 0x1ad   :  { %181 = vperm.xlu2 %350, %v532_v60  }
 0x1ff   :  { %v173_v61 = vpop.permute.xlu2 %172 }
 0x200   :  { %v183_v0 = vperm.slane %v173_v61, %v130_v28 }
 0x207   :  { %v182_v62 = vpop.permute.xlu2 %181 }
 0x208   :  { %v186_v4 = vperm.slane %v182_v62, %v130_v28 }
 0x218   :  { %v176_v63 = vpop.permute.xlu0 %175 }
 0x219   :  { %v179_v1 = vpop.permute.xlu1 %178  ;;  %v184_v2 = vperm.slane %v176_v63, %v130_v28 }
 0x21a   :  { %v185_v3 = vperm.slane %v179_v1, %v130_v28 }
 0x21b   :  { %v187_v5 = vsel %vm135_vm1, %v184_v2, %v183_v0 }
 0x21c   :  { %v188_v6 = vsel %vm137_vm2, %v185_v3, %v187_v5 }
 0x21d   :  { %v189_v7 = vsel %vm139_vm3, %v186_v4, %v188_v6 }
 0x21e   :  { %v191_v8 = vsel %vm142_vm4, %v189_v7, 0.0 }
 0x21f   :  { %192 = vadd.xlane.f32.xlu2 %v191_v8 }
 0x292   :  { %v193_v9 = vpop.xlane.xlu2 %192 }
 0x293   :  { %v195_v11 = vperm.slane %v193_v9, 0  ;;  %v196_v12 = vperm.slane %v193_v9, 1  ;;  %v197_v14 = vperm.slane %v193_v9, 2  ;;  %v539_v15 = vperm.slane %v193_v9, 3 }
 0x295   :  { %361 = vrcp.f32 %v195_v11  ;;  %v212_v26 = vand.u32 2147483647, %v195_v11  ;;  %v214_v27 = vand.u32 2147483648, %v195_v11  ;;  %v242_v32 = vand.u32 2147483647, %v197_v14 }
 0x296   :  { %363 = vrcp.f32 %v196_v12  ;;  %v244_v33 = vand.u32 2147483648, %v197_v14  ;;  %vm208_vm7 = vweird.f32 %v195_v11  ;;  %vm238_vm8 = vweird.f32 %v197_v14 }
 0x297   :  { %365 = vrcp.f32 %v197_v14  ;;  %vm213_vm10 = vcmp.eq.f32.partialorder %v212_v26, 8.507059e+37  ;;  %v215_v37 = vor.u32 1.1754944e-38, %v214_v27  ;;  %vm243_vm13 = vcmp.eq.f32.partialorder %v242_v32, 8.507059e+37 }
 0x298   :  { %367 = vrcp.f32 %v539_v15  ;;  %v245_v42 = vor.u32 1.1754944e-38, %v244_v33  ;;  %v229_v44 = vand.u32 2147483648, %v196_v12  ;;  %vm223_vm14 = vweird.f32 %v196_v12 }
 0x299   :  { %v227_v47 = vand.u32 2147483647, %v196_v12  ;;  %v259_v55 = vand.u32 2147483648, %v539_v15 }
 0x29a   :  { %v230_v52 = vor.u32 1.1754944e-38, %v229_v44 }
 0x29b   :  { %v362_v16 = vpop.eup %361  ;;  %vm228_vm0 = vcmp.eq.f32.partialorder %v227_v47, 8.507059e+37  ;;  %v260_v61 = vor.u32 1.1754944e-38, %v259_v55 }
 0x29c   :  { %v364_v17 = vpop.eup %363  ;;  %v204_v18 = vmul.f32 %v362_v16, %v195_v11  ;;  %vm209_vm5 = vweird.f32 %v362_v16 }
 0x29d   :  { %v366_v19 = vpop.eup %365  ;;  %v219_v21 = vmul.f32 %v364_v17, %v196_v12  ;;  %vm210_vm9 = vmor %vm208_vm7, %vm209_vm5  ;;  %vm224_vm11 = vweird.f32 %v364_v17  ;;  %vm253_vm5 = vweird.f32 %v539_v15 }
 0x29e   :  { %v368_v23 = vpop.eup %367  ;;  %v234_v24 = vmul.f32 %v366_v19, %v197_v14  ;;  %v205_v25 = vsub.f32 1.0, %v204_v18  ;;  %vm239_vm6 = vweird.f32 %v366_v19  ;;  %vm225_vm15 = vmor %vm223_vm14, %vm224_vm11 }
 0x29f   :  { %v220_v28 = vsub.f32 1.0, %v219_v21  ;;  %v249_v29 = vmul.f32 %v368_v23, %v539_v15  ;;  %vm240_vm12 = vmor %vm238_vm8, %vm239_vm6  ;;  %vm254_vm4 = vweird.f32 %v368_v23 }
 0x2a0   :  { %v235_v30 = vsub.f32 1.0, %v234_v24  ;;  %v206_v31 = vmul.f32 %v362_v16, %v205_v25  ;;  %vm255_vm6 = vmor %vm253_vm5, %vm254_vm4 }
 0x2a1   :  { %v221_v34 = vmul.f32 %v364_v17, %v220_v28  ;;  %v250_v41 = vsub.f32 1.0, %v249_v29 }
 0x2a2   :  { %v236_v35 = vmul.f32 %v366_v19, %v235_v30  ;;  %v207_v36 = vadd.f32 %v362_v16, %v206_v31 }
 0x2a3   :  { %v222_v40 = vadd.f32 %v364_v17, %v221_v34  ;;  %v251_v51 = vmul.f32 %v368_v23, %v250_v41 }
 0x2a4   :  { %v237_v38 = vadd.f32 %v366_v19, %v236_v35  ;;  %v211_v39 = vsel %vm210_vm9, %v362_v16, %v207_v36 }
 0x2a5   :  { %v216_v43 = vsel %vm213_vm10, %v215_v37, %v211_v39  ;;  %v226_v50 = vsel %vm225_vm15, %v364_v17, %v222_v40  ;;  %v252_v54 = vadd.f32 %v368_v23, %v251_v51 }
 0x2a6   :  { %v241_v45 = vsel %vm240_vm12, %v366_v19, %v237_v38  ;;  %v217_v46 = vmul.f32 %v523_v57, %v216_v43  ;;  %v231_v53 = vsel %vm228_vm0, %v230_v52, %v226_v50  ;;  %v257_v57 = vand.u32 2147483647, %v539_v15 }
 0x2a7   :  { %v246_v48 = vsel %vm243_vm13, %v245_v42, %v241_v45  ;;  %v232_v56 = vmul.f32 %v525_v58, %v231_v53 }
 0x2a8   :  { %v247_v49 = vmul.f32 %v528_v59, %v246_v48  ;;  %265 = vperm.xlu1 %352, %v217_v46   ;;  %v256_v59 = vsel %vm255_vm6, %v368_v23, %v252_v54  ;;  %vm258_vm7 = vcmp.eq.f32.partialorder %v257_v57, 8.507059e+37 }
 0x2a9   :  { %v261_v62 = vsel %vm258_vm7, %v260_v61, %v256_v59 }
 0x2aa   :  { %275 = vperm.xlu0 %351, %v247_v49   ;;  %v262_v63 = vmul.f32 %v532_v60, %v261_v62 }
 0x2b0   :  { %270 = vperm.xlu1 %352, %v232_v56  }
 0x2b8   :  { %280 = vperm.xlu1 %352, %v262_v63  }
 0x31a   :  { %v266_v0 = vpop.permute.xlu1 %265 }
 0x31b   :  { %v283_v1 = vmul.f32 %v266_v0, %v507_v10 }
 0x31c   :  { %v276_v2 = vpop.permute.xlu0 %275 }
 0x31d   :  { %v285_v3 = vmul.f32 %v276_v2, %v509_v13  ;;  %v287_v58 = vrot.slane %v283_v1, 4 }
 0x31f   :  { %v299_v4 = vrot.slane %v285_v3, 4  ;;  %v288_v5 = vadd.f32 %v287_v58, %v283_v1 }
 0x321   :  { %v300_v8 = vadd.f32 %v299_v4, %v285_v3  ;;  %v289_v9 = vrot.slane %v288_v5, 2 }
 0x322   :  { %v271_v6 = vpop.permute.xlu1 %270 }
 0x323   :  { %v284_v7 = vmul.f32 %v271_v6, %v513_v20  ;;  %v301_v14 = vrot.slane %v300_v8, 2  ;;  %v290_v15 = vadd.f32 %v289_v9, %v288_v5 }
 0x325   :  { %v293_v11 = vrot.slane %v284_v7, 4  ;;  %v302_v18 = vadd.f32 %v301_v14, %v300_v8  ;;  %v291_v19 = vrot.slane %v290_v15, 1 }
 0x327   :  { %v294_v12 = vadd.f32 %v293_v11, %v284_v7  ;;  %v303_v25 = vrot.slane %v302_v18, 1  ;;  %v292_v26 = vadd.f32 %v291_v19, %v290_v15 }
 0x329   :  { %v295_v60 = vrot.slane %v294_v12, 2  ;;  %v304_v29 = vadd.f32 %v303_v25, %v302_v18  ;;  %v311_v30 = vmul.f32 0.125, %v292_v26 }
 0x32a   :  { %v281_v16 = vpop.permute.xlu1 %280 }
 0x32b   :  { %v296_v17 = vadd.f32 %v295_v60, %v294_v12  ;;  %v286_v10 = vmul.f32 %v281_v16, %v515_v22  ;;  %v313_v22 = vmul.f32 0.125, %v304_v29 }
 0x32d   :  { %v297_v13 = vrot.slane %v296_v17, 1  ;;  %v305_v21 = vrot.slane %v286_v10, 4 }
 0x32f   :  { %v298_v23 = vadd.f32 %v297_v13, %v296_v17  ;;  %v306_v24 = vadd.f32 %v305_v21, %v286_v10 }
 0x331   :  { %v307_v20 = vrot.slane %v306_v24, 2  ;;  %v312_v27 = vmul.f32 0.125, %v298_v23 }
 0x333   :  { %v308_v28 = vadd.f32 %v307_v20, %v306_v24  ;;  %v319_v33 = vsel %vm135_vm1, %v312_v27, %v311_v30 }
 0x334   :  { %v320_v35 = vsel %vm137_vm2, %v313_v22, %v319_v33 }
 0x335   :  { %v309_v31 = vrot.slane %v308_v28, 1 }
 0x337   :  { %v310_v32 = vadd.f32 %v309_v31, %v308_v28 }
 0x339   :  { %v314_v34 = vmul.f32 0.125, %v310_v32 }
 0x33b   :  { %v321_v36 = vsel %vm139_vm3, %v314_v34, %v320_v35 }
 0x33c   :  { %323 = vst [vmem:[#allocation8] sm:$0xf] %v321_v36 }
 0x33d   :  { %334 = dma.vmem_to_hbm [thread:$0]  %s330_s2, 64, %s332_s30, [#allocation4]  }
 0x33e   :  { %469 = dma.done.wait [#allocation4], 64  }
 0x33f   :  { %470 = vsyncadd [#allocation4], 4294967232 }
 0x340   :  { %339 = vsyncpa [#allocation3], 1 }
 0x341   :  { %340 = vsyncpa [#allocation6], 1 }
 0x342   :  { %341 = vsyncpa [#allocation4], 1 }

</bundles_post_ra>
